<compile_context>
chip_gen: v5e
topology: v5e:2x2
jax: 0.10.0
libtpu: 0.0.40
codegen_flags: <defaults>
</compile_context>

<pallas_src>
import functools

import jax
import jax.numpy as jnp
import numpy as np
from jax.experimental import pallas as pl
from jax.experimental.pallas import tpu as pltpu


def _layer_kernel(mask_ref, x_ref,
                  wqkv_ref, bqkv_ref,
                  wo_ref, bo_ref,
                  w1_ref, b1_ref, w2_ref, b2_ref,
                  gamma_ref, beta_ref,
                  out_ref,
                  *, num_heads: int, head_dim: int, eps: float):
    H, D = num_heads, head_dim
    E = H * D

    x_f32 = x_ref[0].astype(jnp.float32)          # (S, E): residual / LN path in f32
    mask = mask_ref[0]                            # (1, S) float32; >0 means "masked key"
    cdt = wqkv_ref.dtype                          # MXU input dtype (bf16 or f32)

    x_c = x_f32.astype(cdt)

    # --- fused QKV projection: single (S,E)@(E,3E) MXU op, f32 accumulation.
    # The 1/sqrt(head_dim) scale is pre-folded into the Q columns host-side.
    qkv = jnp.dot(x_c, wqkv_ref[...], preferred_element_type=jnp.float32)
    qkv = (qkv + bqkv_ref[...]).astype(cdt)       # (S, 3E)

    # --- head-major (H, S, D) views. One-time layout shuffle (slices + leading-axis
    # stack); all attention matmuls below are leading-batch dot_generals, so there
    # are no per-head MXU launches and no materialized kh.T.
    def split_heads(t):                           # t: (S, E) -> (H, S, D)
        return jnp.stack([t[:, h * D:(h + 1) * D] for h in range(H)], axis=0)

    q = split_heads(qkv[:, :E])
    k = split_heads(qkv[:, E:2 * E])
    v = split_heads(qkv[:, 2 * E:])

    # logits: batched q @ k^T via shared-D contraction (no explicit transpose).
    logits = jnp.einsum("hqd,hkd->hqk", q, k,
                        preferred_element_type=jnp.float32)          # (H, S, S) f32

    big_neg = jnp.float32(-1e30)                  # finite: fully-masked rows stay finite
    logits = jnp.where(mask[None, :, :] > 0, big_neg, logits)

    # --- softmax (f32). Divide replaced by EUP reciprocal + multiply.
    m = jnp.max(logits, axis=-1, keepdims=True)
    p = jnp.exp(logits - m)
    denom = jnp.sum(p, axis=-1, keepdims=True)
    a = p * pl.reciprocal(denom, approx=True)

    ctx = jnp.einsum("hqk,hkd->hqd", a.astype(cdt), v,
                     preferred_element_type=jnp.float32)             # (H, S, D) f32
    attn = jnp.concatenate([ctx[h] for h in range(H)], axis=-1)      # (S, E)

    attn = jnp.dot(attn.astype(cdt), wo_ref[...],
                   preferred_element_type=jnp.float32) + bo_ref[...]

    # --- shared LayerNorm params loaded once, reused for both applications.
    gamma = gamma_ref[...]
    beta = beta_ref[...]

    def layernorm(y):                             # f32 VPU math
        mu = jnp.mean(y, axis=-1, keepdims=True)
        var = jnp.mean((y - mu) ** 2, axis=-1, keepdims=True)
        return (y - mu) * jax.lax.rsqrt(var + eps) * gamma + beta

    x1 = layernorm(attn + x_f32)

    # --- feed-forward (Linear-ReLU-Linear), bf16 in / f32 accumulate.
    h1 = jnp.dot(x1.astype(cdt), w1_ref[...],
                 preferred_element_type=jnp.float32) + b1_ref[...]
    h1 = jnp.maximum(h1, 0.0).astype(cdt)
    ff = jnp.dot(h1, w2_ref[...],
                 preferred_element_type=jnp.float32) + b2_ref[...]

    x2 = layernorm(ff + x1)
    out_ref[0] = x2.astype(out_ref.dtype)


def image_encoder_layer(x, pad_mask, params, *, num_heads,
                        compute_dtype=jnp.bfloat16):
    """x: (B, S, E) float32; pad_mask: (B, 1, 1, S) bool. Returns (y, pad_mask)."""
    B, S, E = x.shape
    D = E // num_heads
    F = params["w1"].shape[1]
    scale = jnp.float32(D) ** 0.5

    # Fuse Q|K|V weights into one (E, 3E) matmul; fold 1/sqrt(head_dim) into Q.
    wqkv = jnp.concatenate(
        [params["wq"] / scale, params["wk"], params["wv"]], axis=1)
    bqkv = jnp.concatenate(
        [params["bq"] / scale, params["bk"], params["bv"]], axis=1)

    cdt = jnp.dtype(compute_dtype)
    wqkv_c = wqkv.astype(cdt)
    wo_c = params["wo"].astype(cdt)
    w1_c = params["w1"].astype(cdt)
    w2_c = params["w2"].astype(cdt)

    # mask -> float (1.0 where masked), shaped (B, 1, S) for blocked DMA.
    mask_f = pad_mask.reshape(B, 1, S).astype(jnp.float32)

    # Weights/biases use a constant index_map so they are DMA'd into VMEM once and
    # stay resident across the batch grid. At realistic sizes (E~1024, F~4096) on
    # v7x (64 MiB VMEM) the FF weights should additionally be tiled over F.
    full = lambda shape: pl.BlockSpec(shape, lambda b: (0,) * len(shape))

    kernel = functools.partial(_layer_kernel, num_heads=num_heads,
                               head_dim=D, eps=1e-5)

    # Cost hints for the XLA scheduler.
    flops = B * (2 * S * E * 3 * E       # fused qkv
                 + 4 * S * S * E         # logits + context
                 + 2 * S * E * E         # out proj
                 + 4 * S * E * F)        # ff1 + ff2
    transcendentals = B * (num_heads * S * S + num_heads * S + 2 * S)
    wbytes = cdt.itemsize
    weight_bytes = (3 * E * E + E * E + E * F + F * E) * wbytes \
                   + (3 * E + E + F + E + 2 * E) * 4
    act_bytes = (2 * S * E + S) * 4      # x + out + mask per batch element
    bytes_accessed = int(weight_bytes + B * act_bytes)

    # Explicit VMEM budget: resident weights + double-buffered activations +
    # intermediates (qkv, logits, ff hidden, LN temps), with margin.
    interm = (3 * S * E + num_heads * S * S + S * F + 4 * S * E) * 4
    vmem_limit = int(min(64 << 20,
                         max(2 * weight_bytes + 4 * act_bytes + 2 * interm + (4 << 20),
                             16 << 20)))

    y = pl.pallas_call(
        kernel,
        out_shape=jax.ShapeDtypeStruct((B, S, E), x.dtype),
        grid_spec=pltpu.PrefetchScalarGridSpec(
            num_scalar_prefetch=0,
            grid=(B,),
            in_specs=[
                pl.BlockSpec((1, 1, S), lambda b: (b, 0, 0)),   # mask
                pl.BlockSpec((1, S, E), lambda b: (b, 0, 0)),   # x
                full((E, 3 * E)), full((1, 3 * E)),             # fused qkv proj
                full((E, E)), full((1, E)),                     # out proj
                full((E, F)), full((1, F)),                     # ff1
                full((F, E)), full((1, E)),                     # ff2
                full((1, E)), full((1, E)),                     # layernorm gamma, beta
            ],
            out_specs=pl.BlockSpec((1, S, E), lambda b: (b, 0, 0)),
        ),
        compiler_params=pltpu.CompilerParams(
            dimension_semantics=("parallel",),     # megacore: shard batch across TCs
            vmem_limit_bytes=vmem_limit,
        ),
        cost_estimate=pl.CostEstimate(flops=int(flops),
                                      transcendentals=int(transcendentals),
                                      bytes_accessed=bytes_accessed),
    )(mask_f, x,
      wqkv_c, bqkv, wo_c, params["bo"],
      w1_c, params["b1"], w2_c, params["b2"],
      params["gamma"], params["beta"])
    return y, pad_mask


def _reference(x, pad_mask, params, *, num_heads):
    """Pure-JAX f32 reference mirroring the PyTorch forward."""
    B, S, E = x.shape
    D = E // num_heads

    def lin(y, w, b):
        return y @ w + b

    q = lin(x, params["wq"], params["bq"]).reshape(B, S, num_heads, D).transpose(0, 2, 1, 3)
    k = lin(x, params["wk"], params["bk"]).reshape(B, S, num_heads, D).transpose(0, 2, 1, 3)
    v = lin(x, params["wv"], params["bv"]).reshape(B, S, num_heads, D).transpose(0, 2, 1, 3)
    logits = jnp.einsum("bhqd,bhkd->bhqk", q, k) / (D ** 0.5)
    logits = jnp.where(pad_mask, -jnp.inf, logits)
    a = jax.nn.softmax(logits, axis=-1)
    o = jnp.einsum("bhqk,bhkd->bhqd", a, v).transpose(0, 2, 1, 3).reshape(B, S, E)
    o = lin(o, params["wo"], params["bo"])

    def ln(y):
        mu = jnp.mean(y, axis=-1, keepdims=True)
        var = jnp.mean((y - mu) ** 2, axis=-1, keepdims=True)
        return (y - mu) / jnp.sqrt(var + 1e-5) * params["gamma"] + params["beta"]

    x1 = ln(o + x)
    h = jnp.maximum(lin(x1, params["w1"], params["b1"]), 0.0)
    ff = lin(h, params["w2"], params["b2"])
    return ln(ff + x1)


def _make_params(key, embed_dim, ff_dim):
    ks = jax.random.split(key, 12)
    s = 0.1

    def w(k, shape):
        return jax.random.normal(k, shape, jnp.float32) * s

    return {
        # nn.Linear weights stored pre-transposed as (in, out)
        "wq": w(ks[0], (embed_dim, embed_dim)), "bq": w(ks[1], (1, embed_dim)),
        "wk": w(ks[2], (embed_dim, embed_dim)), "bk": w(ks[3], (1, embed_dim)),
        "wv": w(ks[4], (embed_dim, embed_dim)), "bv": w(ks[5], (1, embed_dim)),
        "wo": w(ks[6], (embed_dim, embed_dim)), "bo": w(ks[7], (1, embed_dim)),
        "w1": w(ks[8], (embed_dim, ff_dim)),    "b1": w(ks[9], (1, ff_dim)),
        "w2": w(ks[10], (ff_dim, embed_dim)),   "b2": w(ks[11], (1, embed_dim)),
        "gamma": jnp.ones((1, embed_dim), jnp.float32),
        "beta": jnp.zeros((1, embed_dim), jnp.float32),
    }


if __name__ == "__main__":
    B, S, E, H = 2, 8, 32, 4
    FF = 4 * E

    key = jax.random.PRNGKey(0)
    kx, kp = jax.random.split(key)
    x = jax.random.normal(kx, (B, S, E), jnp.float32)

    # pad_mask: True == masked. Batch 0 fully visible, batch 1 masks last 3 keys.
    mask = np.zeros((B, 1, 1, S), dtype=bool)
    mask[1, 0, 0, S - 3:] = True
    pad_mask = jnp.asarray(mask)

    params = _make_params(kp, E, FF)
    y_ref = _reference(x, pad_mask, params, num_heads=H)

    # f32 MXU path: tight correctness check (only approximation is the EUP reciprocal).
    y32, mask_out = image_encoder_layer(x, pad_mask, params, num_heads=H,
                                        compute_dtype=jnp.float32)
    y32 = jax.block_until_ready(y32)
    assert np.allclose(np.asarray(y32), np.asarray(y_ref), atol=5e-3, rtol=5e-3), (
        "f32 Pallas kernel output does not match reference")

    # bf16 MXU path (performance configuration): looser tolerance.
    ybf, _ = image_encoder_layer(x, pad_mask, params, num_heads=H,
                                 compute_dtype=jnp.bfloat16)
    ybf = jax.block_until_ready(ybf)
    assert np.allclose(np.asarray(ybf), np.asarray(y_ref), atol=5e-2, rtol=5e-2), (
        "bf16 Pallas kernel output does not match reference")

    assert bool(jnp.array_equal(mask_out, pad_mask))
    print("KERNEL_OK")
</pallas_src>

<mosaic_0001>
module attributes {stable_mosaic.version = 11 : i64} {
  func.func @_layer_kernel(%arg0: i32, %arg1: memref<1x1x8xf32, #tpu.memory_space<vmem>>, %arg2: memref<1x8x32xf32, #tpu.memory_space<vmem>>, %arg3: memref<32x96xf32, #tpu.memory_space<vmem>>, %arg4: memref<1x96xf32, #tpu.memory_space<vmem>>, %arg5: memref<32x32xf32, #tpu.memory_space<vmem>>, %arg6: memref<1x32xf32, #tpu.memory_space<vmem>>, %arg7: memref<32x128xf32, #tpu.memory_space<vmem>>, %arg8: memref<1x128xf32, #tpu.memory_space<vmem>>, %arg9: memref<128x32xf32, #tpu.memory_space<vmem>>, %arg10: memref<1x32xf32, #tpu.memory_space<vmem>>, %arg11: memref<1x32xf32, #tpu.memory_space<vmem>>, %arg12: memref<1x32xf32, #tpu.memory_space<vmem>>, %arg13: memref<1x8x32xf32, #tpu.memory_space<vmem>>) attributes {dimension_semantics = [#tpu.dimension_semantics<parallel>], iteration_bounds = array<i64: 2>, scalar_prefetch = 0 : i64, scratch_operands = 0 : i64, tpu.core_type = #tpu.core_type<tc>, window_params = [{transform_indices = @transform_0, window_bounds = array<i64: 1, 1, 8>}, {transform_indices = @transform_1, window_bounds = array<i64: 1, 8, 32>}, {pipeline_mode = #tpu.pipeline_mode<synchronous>, transform_indices = @transform_2, window_bounds = array<i64: 32, 96>}, {pipeline_mode = #tpu.pipeline_mode<synchronous>, transform_indices = @transform_3, window_bounds = array<i64: 1, 96>}, {pipeline_mode = #tpu.pipeline_mode<synchronous>, transform_indices = @transform_4, window_bounds = array<i64: 32, 32>}, {pipeline_mode = #tpu.pipeline_mode<synchronous>, transform_indices = @transform_5, window_bounds = array<i64: 1, 32>}, {pipeline_mode = #tpu.pipeline_mode<synchronous>, transform_indices = @transform_6, window_bounds = array<i64: 32, 128>}, {pipeline_mode = #tpu.pipeline_mode<synchronous>, transform_indices = @transform_7, window_bounds = array<i64: 1, 128>}, {pipeline_mode = #tpu.pipeline_mode<synchronous>, transform_indices = @transform_8, window_bounds = array<i64: 128, 32>}, {pipeline_mode = #tpu.pipeline_mode<synchronous>, transform_indices = @transform_9, window_bounds = array<i64: 1, 32>}, {pipeline_mode = #tpu.pipeline_mode<synchronous>, transform_indices = @transform_10, window_bounds = array<i64: 1, 32>}, {pipeline_mode = #tpu.pipeline_mode<synchronous>, transform_indices = @transform_11, window_bounds = array<i64: 1, 32>}, {transform_indices = @transform_12, window_bounds = array<i64: 1, 8, 32>}]} {
    %c0 = arith.constant 0 : index
    %c0_0 = arith.constant 0 : index
    %c0_1 = arith.constant 0 : index
    %0 = vector.load %arg2[%c0, %c0_0, %c0_1] : memref<1x8x32xf32, #tpu.memory_space<vmem>>, vector<1x8x32xf32>
    %1 = vector.shape_cast %0 : vector<1x8x32xf32> to vector<8x32xf32>
    %c0_2 = arith.constant 0 : index
    %c0_3 = arith.constant 0 : index
    %c0_4 = arith.constant 0 : index
    %2 = vector.load %arg1[%c0_2, %c0_3, %c0_4] : memref<1x1x8xf32, #tpu.memory_space<vmem>>, vector<1x1x8xf32>
    %3 = vector.shape_cast %2 : vector<1x1x8xf32> to vector<1x8xf32>
    %c0_5 = arith.constant 0 : index
    %c0_6 = arith.constant 0 : index
    %4 = vector.load %arg3[%c0_5, %c0_6] : memref<32x96xf32, #tpu.memory_space<vmem>>, vector<32x96xf32>
    %cst = arith.constant dense<0.000000e+00> : vector<8x96xf32>
    %5 = tpu.matmul %1, %4, %cst {dimension_numbers = #tpu.dot_dimension_numbers<[1], [0], [0], [1], [0, 0, 1, 1], [], []>} : vector<8x32xf32>, vector<32x96xf32>, vector<8x96xf32> -> vector<8x96xf32>
    %c0_7 = arith.constant 0 : index
    %c0_8 = arith.constant 0 : index
    %6 = vector.load %arg4[%c0_7, %c0_8] : memref<1x96xf32, #tpu.memory_space<vmem>>, vector<1x96xf32>
    %7 = vector.broadcast %6 : vector<1x96xf32> to vector<8x96xf32>
    %8 = arith.addf %5, %7 : vector<8x96xf32>
    %9 = vector.extract_strided_slice %8 {offsets = [0, 0], sizes = [8, 32], strides = [1, 1]} : vector<8x96xf32> to vector<8x32xf32>
    %10 = vector.extract_strided_slice %9 {offsets = [0, 0], sizes = [8, 8], strides = [1, 1]} : vector<8x32xf32> to vector<8x8xf32>
    %11 = vector.extract_strided_slice %9 {offsets = [0, 8], sizes = [8, 8], strides = [1, 1]} : vector<8x32xf32> to vector<8x8xf32>
    %12 = vector.extract_strided_slice %9 {offsets = [0, 16], sizes = [8, 8], strides = [1, 1]} : vector<8x32xf32> to vector<8x8xf32>
    %13 = vector.extract_strided_slice %9 {offsets = [0, 24], sizes = [8, 8], strides = [1, 1]} : vector<8x32xf32> to vector<8x8xf32>
    %14 = vector.shape_cast %10 : vector<8x8xf32> to vector<1x8x8xf32>
    %15 = vector.shape_cast %11 : vector<8x8xf32> to vector<1x8x8xf32>
    %16 = vector.shape_cast %12 : vector<8x8xf32> to vector<1x8x8xf32>
    %17 = vector.shape_cast %13 : vector<8x8xf32> to vector<1x8x8xf32>
    %18 = tpu.concatenate %14, %15, %16, %17 in 0 : vector<1x8x8xf32>, vector<1x8x8xf32>, vector<1x8x8xf32>, vector<1x8x8xf32> -> vector<4x8x8xf32>
    %19 = vector.extract_strided_slice %8 {offsets = [0, 32], sizes = [8, 32], strides = [1, 1]} : vector<8x96xf32> to vector<8x32xf32>
    %20 = vector.extract_strided_slice %19 {offsets = [0, 0], sizes = [8, 8], strides = [1, 1]} : vector<8x32xf32> to vector<8x8xf32>
    %21 = vector.extract_strided_slice %19 {offsets = [0, 8], sizes = [8, 8], strides = [1, 1]} : vector<8x32xf32> to vector<8x8xf32>
    %22 = vector.extract_strided_slice %19 {offsets = [0, 16], sizes = [8, 8], strides = [1, 1]} : vector<8x32xf32> to vector<8x8xf32>
    %23 = vector.extract_strided_slice %19 {offsets = [0, 24], sizes = [8, 8], strides = [1, 1]} : vector<8x32xf32> to vector<8x8xf32>
    %24 = vector.shape_cast %20 : vector<8x8xf32> to vector<1x8x8xf32>
    %25 = vector.shape_cast %21 : vector<8x8xf32> to vector<1x8x8xf32>
    %26 = vector.shape_cast %22 : vector<8x8xf32> to vector<1x8x8xf32>
    %27 = vector.shape_cast %23 : vector<8x8xf32> to vector<1x8x8xf32>
    %28 = tpu.concatenate %24, %25, %26, %27 in 0 : vector<1x8x8xf32>, vector<1x8x8xf32>, vector<1x8x8xf32>, vector<1x8x8xf32> -> vector<4x8x8xf32>
    %29 = vector.extract_strided_slice %8 {offsets = [0, 64], sizes = [8, 32], strides = [1, 1]} : vector<8x96xf32> to vector<8x32xf32>
    %30 = vector.extract_strided_slice %29 {offsets = [0, 0], sizes = [8, 8], strides = [1, 1]} : vector<8x32xf32> to vector<8x8xf32>
    %31 = vector.extract_strided_slice %29 {offsets = [0, 8], sizes = [8, 8], strides = [1, 1]} : vector<8x32xf32> to vector<8x8xf32>
    %32 = vector.extract_strided_slice %29 {offsets = [0, 16], sizes = [8, 8], strides = [1, 1]} : vector<8x32xf32> to vector<8x8xf32>
    %33 = vector.extract_strided_slice %29 {offsets = [0, 24], sizes = [8, 8], strides = [1, 1]} : vector<8x32xf32> to vector<8x8xf32>
    %34 = vector.shape_cast %30 : vector<8x8xf32> to vector<1x8x8xf32>
    %35 = vector.shape_cast %31 : vector<8x8xf32> to vector<1x8x8xf32>
    %36 = vector.shape_cast %32 : vector<8x8xf32> to vector<1x8x8xf32>
    %37 = vector.shape_cast %33 : vector<8x8xf32> to vector<1x8x8xf32>
    %38 = tpu.concatenate %34, %35, %36, %37 in 0 : vector<1x8x8xf32>, vector<1x8x8xf32>, vector<1x8x8xf32>, vector<1x8x8xf32> -> vector<4x8x8xf32>
    "tpu.trace_start"() <{level = 10 : i32, message = "hqd,hkd->hqk"}> : () -> ()
    %cst_9 = arith.constant dense<0.000000e+00> : vector<4x8x8xf32>
    %39 = tpu.matmul %18, %28, %cst_9 {dimension_numbers = #tpu.dot_dimension_numbers<[2], [2], [1], [1], [0, 0, 0, 1, 1, 1], [0], [0]>} : vector<4x8x8xf32>, vector<4x8x8xf32>, vector<4x8x8xf32> -> vector<4x8x8xf32>
    "tpu.trace_stop"() : () -> ()
    %40 = vector.shape_cast %3 : vector<1x8xf32> to vector<1x1x8xf32>
    %cst_10 = arith.constant 0.000000e+00 : f32
    %41 = vector.broadcast %cst_10 : f32 to vector<1x1x8xf32>
    %42 = arith.cmpf ogt, %40, %41 : vector<1x1x8xf32>
    %cst_11 = arith.constant -1.000000e+30 : f32
    %43 = vector.shape_cast %42 : vector<1x1x8xi1> to vector<1x1x8xi1>
    %44 = vector.broadcast %43 : vector<1x1x8xi1> to vector<4x8x8xi1>
    %45 = vector.broadcast %cst_11 : f32 to vector<4x8x8xf32>
    %46 = arith.select %44, %45, %39 : vector<4x8x8xi1>, vector<4x8x8xf32>
    %cst_12 = arith.constant dense<0xFF800000> : vector<4x8xf32>
    %47 = vector.multi_reduction <maximumf>, %46, %cst_12 [2] : vector<4x8x8xf32> to vector<4x8xf32>
    %48 = vector.shape_cast %47 : vector<4x8xf32> to vector<4x8x1xf32>
    %49 = vector.broadcast %48 : vector<4x8x1xf32> to vector<4x8x8xf32>
    %50 = arith.subf %46, %49 : vector<4x8x8xf32>
    %51 = math.exp %50 : vector<4x8x8xf32>
    %cst_13 = arith.constant dense<0.000000e+00> : vector<4x8xf32>
    %52 = vector.multi_reduction <add>, %51, %cst_13 [2] : vector<4x8x8xf32> to vector<4x8xf32>
    %53 = vector.shape_cast %52 : vector<4x8xf32> to vector<4x8x1xf32>
    %54 = tpu.reciprocal %53 {approx = true} : vector<4x8x1xf32> -> vector<4x8x1xf32>
    %55 = vector.broadcast %54 : vector<4x8x1xf32> to vector<4x8x8xf32>
    %56 = arith.mulf %51, %55 : vector<4x8x8xf32>
    "tpu.trace_start"() <{level = 10 : i32, message = "hqk,hkd->hqd"}> : () -> ()
    %cst_14 = arith.constant dense<0.000000e+00> : vector<4x8x8xf32>
    %57 = tpu.matmul %56, %38, %cst_14 {dimension_numbers = #tpu.dot_dimension_numbers<[2], [1], [1], [2], [0, 0, 0, 1, 1, 2], [0], [0]>} : vector<4x8x8xf32>, vector<4x8x8xf32>, vector<4x8x8xf32> -> vector<4x8x8xf32>
    "tpu.trace_stop"() : () -> ()
    %58 = vector.extract_strided_slice %57 {offsets = [0, 0, 0], sizes = [1, 8, 8], strides = [1, 1, 1]} : vector<4x8x8xf32> to vector<1x8x8xf32>
    %59 = vector.shape_cast %58 : vector<1x8x8xf32> to vector<8x8xf32>
    %60 = vector.extract_strided_slice %57 {offsets = [1, 0, 0], sizes = [1, 8, 8], strides = [1, 1, 1]} : vector<4x8x8xf32> to vector<1x8x8xf32>
    %61 = vector.shape_cast %60 : vector<1x8x8xf32> to vector<8x8xf32>
    %62 = vector.extract_strided_slice %57 {offsets = [2, 0, 0], sizes = [1, 8, 8], strides = [1, 1, 1]} : vector<4x8x8xf32> to vector<1x8x8xf32>
    %63 = vector.shape_cast %62 : vector<1x8x8xf32> to vector<8x8xf32>
    %64 = vector.extract_strided_slice %57 {offsets = [3, 0, 0], sizes = [1, 8, 8], strides = [1, 1, 1]} : vector<4x8x8xf32> to vector<1x8x8xf32>
    %65 = vector.shape_cast %64 : vector<1x8x8xf32> to vector<8x8xf32>
    %66 = tpu.concatenate %59, %61, %63, %65 in 1 : vector<8x8xf32>, vector<8x8xf32>, vector<8x8xf32>, vector<8x8xf32> -> vector<8x32xf32>
    %c0_15 = arith.constant 0 : index
    %c0_16 = arith.constant 0 : index
    %67 = vector.load %arg5[%c0_15, %c0_16] : memref<32x32xf32, #tpu.memory_space<vmem>>, vector<32x32xf32>
    %cst_17 = arith.constant dense<0.000000e+00> : vector<8x32xf32>
    %68 = tpu.matmul %66, %67, %cst_17 {dimension_numbers = #tpu.dot_dimension_numbers<[1], [0], [0], [1], [0, 0, 1, 1], [], []>} : vector<8x32xf32>, vector<32x32xf32>, vector<8x32xf32> -> vector<8x32xf32>
    %c0_18 = arith.constant 0 : index
    %c0_19 = arith.constant 0 : index
    %69 = vector.load %arg6[%c0_18, %c0_19] : memref<1x32xf32, #tpu.memory_space<vmem>>, vector<1x32xf32>
    %70 = vector.broadcast %69 : vector<1x32xf32> to vector<8x32xf32>
    %71 = arith.addf %68, %70 : vector<8x32xf32>
    %c0_20 = arith.constant 0 : index
    %c0_21 = arith.constant 0 : index
    %72 = vector.load %arg11[%c0_20, %c0_21] : memref<1x32xf32, #tpu.memory_space<vmem>>, vector<1x32xf32>
    %c0_22 = arith.constant 0 : index
    %c0_23 = arith.constant 0 : index
    %73 = vector.load %arg12[%c0_22, %c0_23] : memref<1x32xf32, #tpu.memory_space<vmem>>, vector<1x32xf32>
    %74 = arith.addf %71, %1 : vector<8x32xf32>
    %cst_24 = arith.constant dense<0.000000e+00> : vector<8xf32>
    %75 = vector.multi_reduction <add>, %74, %cst_24 [1] : vector<8x32xf32> to vector<8xf32>
    %76 = vector.shape_cast %75 : vector<8xf32> to vector<8x1xf32>
    %cst_25 = arith.constant 3.200000e+01 : f32
    %77 = vector.broadcast %cst_25 : f32 to vector<8x1xf32>
    %78 = arith.divf %76, %77 : vector<8x1xf32>
    %79 = vector.broadcast %78 : vector<8x1xf32> to vector<8x32xf32>
    %80 = arith.subf %74, %79 : vector<8x32xf32>
    %81 = arith.mulf %80, %80 : vector<8x32xf32>
    %cst_26 = arith.constant dense<0.000000e+00> : vector<8xf32>
    %82 = vector.multi_reduction <add>, %81, %cst_26 [1] : vector<8x32xf32> to vector<8xf32>
    %83 = vector.shape_cast %82 : vector<8xf32> to vector<8x1xf32>
    %cst_27 = arith.constant 3.200000e+01 : f32
    %84 = vector.broadcast %cst_27 : f32 to vector<8x1xf32>
    %85 = arith.divf %83, %84 : vector<8x1xf32>
    %86 = vector.broadcast %78 : vector<8x1xf32> to vector<8x32xf32>
    %87 = arith.subf %74, %86 : vector<8x32xf32>
    %cst_28 = arith.constant 9.99999974E-6 : f32
    %88 = vector.broadcast %cst_28 : f32 to vector<8x1xf32>
    %89 = arith.addf %85, %88 : vector<8x1xf32>
    %90 = math.rsqrt %89 : vector<8x1xf32>
    %91 = vector.broadcast %90 : vector<8x1xf32> to vector<8x32xf32>
    %92 = arith.mulf %87, %91 : vector<8x32xf32>
    %93 = vector.broadcast %72 : vector<1x32xf32> to vector<8x32xf32>
    %94 = arith.mulf %92, %93 : vector<8x32xf32>
    %95 = vector.broadcast %73 : vector<1x32xf32> to vector<8x32xf32>
    %96 = arith.addf %94, %95 : vector<8x32xf32>
    %c0_29 = arith.constant 0 : index
    %c0_30 = arith.constant 0 : index
    %97 = vector.load %arg7[%c0_29, %c0_30] : memref<32x128xf32, #tpu.memory_space<vmem>>, vector<32x128xf32>
    %cst_31 = arith.constant dense<0.000000e+00> : vector<8x128xf32>
    %98 = tpu.matmul %96, %97, %cst_31 {dimension_numbers = #tpu.dot_dimension_numbers<[1], [0], [0], [1], [0, 0, 1, 1], [], []>} : vector<8x32xf32>, vector<32x128xf32>, vector<8x128xf32> -> vector<8x128xf32>
    %c0_32 = arith.constant 0 : index
    %c0_33 = arith.constant 0 : index
    %99 = vector.load %arg8[%c0_32, %c0_33] : memref<1x128xf32, #tpu.memory_space<vmem>>, vector<1x128xf32>
    %100 = vector.broadcast %99 : vector<1x128xf32> to vector<8x128xf32>
    %101 = arith.addf %98, %100 : vector<8x128xf32>
    %cst_34 = arith.constant 0.000000e+00 : f32
    %102 = vector.broadcast %cst_34 : f32 to vector<8x128xf32>
    %103 = arith.maximumf %101, %102 : vector<8x128xf32>
    %c0_35 = arith.constant 0 : index
    %c0_36 = arith.constant 0 : index
    %104 = vector.load %arg9[%c0_35, %c0_36] : memref<128x32xf32, #tpu.memory_space<vmem>>, vector<128x32xf32>
    %cst_37 = arith.constant dense<0.000000e+00> : vector<8x32xf32>
    %105 = tpu.matmul %103, %104, %cst_37 {dimension_numbers = #tpu.dot_dimension_numbers<[1], [0], [0], [1], [0, 0, 1, 1], [], []>} : vector<8x128xf32>, vector<128x32xf32>, vector<8x32xf32> -> vector<8x32xf32>
    %c0_38 = arith.constant 0 : index
    %c0_39 = arith.constant 0 : index
    %106 = vector.load %arg10[%c0_38, %c0_39] : memref<1x32xf32, #tpu.memory_space<vmem>>, vector<1x32xf32>
    %107 = vector.broadcast %106 : vector<1x32xf32> to vector<8x32xf32>
    %108 = arith.addf %105, %107 : vector<8x32xf32>
    %109 = arith.addf %108, %96 : vector<8x32xf32>
    %cst_40 = arith.constant dense<0.000000e+00> : vector<8xf32>
    %110 = vector.multi_reduction <add>, %109, %cst_40 [1] : vector<8x32xf32> to vector<8xf32>
    %111 = vector.shape_cast %110 : vector<8xf32> to vector<8x1xf32>
    %cst_41 = arith.constant 3.200000e+01 : f32
    %112 = vector.broadcast %cst_41 : f32 to vector<8x1xf32>
    %113 = arith.divf %111, %112 : vector<8x1xf32>
    %114 = vector.broadcast %113 : vector<8x1xf32> to vector<8x32xf32>
    %115 = arith.subf %109, %114 : vector<8x32xf32>
    %116 = arith.mulf %115, %115 : vector<8x32xf32>
    %cst_42 = arith.constant dense<0.000000e+00> : vector<8xf32>
    %117 = vector.multi_reduction <add>, %116, %cst_42 [1] : vector<8x32xf32> to vector<8xf32>
    %118 = vector.shape_cast %117 : vector<8xf32> to vector<8x1xf32>
    %cst_43 = arith.constant 3.200000e+01 : f32
    %119 = vector.broadcast %cst_43 : f32 to vector<8x1xf32>
    %120 = arith.divf %118, %119 : vector<8x1xf32>
    %121 = vector.broadcast %113 : vector<8x1xf32> to vector<8x32xf32>
    %122 = arith.subf %109, %121 : vector<8x32xf32>
    %cst_44 = arith.constant 9.99999974E-6 : f32
    %123 = vector.broadcast %cst_44 : f32 to vector<8x1xf32>
    %124 = arith.addf %120, %123 : vector<8x1xf32>
    %125 = math.rsqrt %124 : vector<8x1xf32>
    %126 = vector.broadcast %125 : vector<8x1xf32> to vector<8x32xf32>
    %127 = arith.mulf %122, %126 : vector<8x32xf32>
    %128 = vector.broadcast %72 : vector<1x32xf32> to vector<8x32xf32>
    %129 = arith.mulf %127, %128 : vector<8x32xf32>
    %130 = vector.broadcast %73 : vector<1x32xf32> to vector<8x32xf32>
    %131 = arith.addf %129, %130 : vector<8x32xf32>
    %c0_45 = arith.constant 0 : index
    %c0_46 = arith.constant 0 : index
    %c0_47 = arith.constant 0 : index
    %132 = vector.load %arg13[%c0_45, %c0_46, %c0_47] : memref<1x8x32xf32, #tpu.memory_space<vmem>>, vector<1x8x32xf32>
    %133 = vector.shape_cast %132 : vector<1x8x32xf32> to vector<8x32xf32>
    %134 = vector.shape_cast %131 : vector<8x32xf32> to vector<1x8x32xf32>
    tpu.vector_store %arg13[%c0_45, %c0_46, %c0_47], %134 {strides = array<i32>} : memref<1x8x32xf32, #tpu.memory_space<vmem>>, vector<1x8x32xf32>,
    return
  }
  func.func @transform_0(%arg0: i32) -> (i32, i32, i32) {
    %c0_i32 = arith.constant 0 : i32
    %c0_i32_0 = arith.constant 0 : i32
    %c0_i32_1 = arith.constant 0 : i32
    return %arg0, %c0_i32, %c0_i32_0 : i32, i32, i32
  }
  func.func @transform_1(%arg0: i32) -> (i32, i32, i32) {
    %c0_i32 = arith.constant 0 : i32
    %c0_i32_0 = arith.constant 0 : i32
    %c0_i32_1 = arith.constant 0 : i32
    return %arg0, %c0_i32, %c0_i32_0 : i32, i32, i32
  }
  func.func @transform_2(%arg0: i32) -> (i32, i32) {
    %c0_i32 = arith.constant 0 : i32
    %c0_i32_0 = arith.constant 0 : i32
    %c0_i32_1 = arith.constant 0 : i32
    return %c0_i32, %c0_i32_0 : i32, i32
  }
  func.func @transform_3(%arg0: i32) -> (i32, i32) {
    %c0_i32 = arith.constant 0 : i32
    %c0_i32_0 = arith.constant 0 : i32
    %c0_i32_1 = arith.constant 0 : i32
    return %c0_i32, %c0_i32_0 : i32, i32
  }
  func.func @transform_4(%arg0: i32) -> (i32, i32) {
    %c0_i32 = arith.constant 0 : i32
    %c0_i32_0 = arith.constant 0 : i32
    %c0_i32_1 = arith.constant 0 : i32
    return %c0_i32, %c0_i32_0 : i32, i32
  }
  func.func @transform_5(%arg0: i32) -> (i32, i32) {
    %c0_i32 = arith.constant 0 : i32
    %c0_i32_0 = arith.constant 0 : i32
    %c0_i32_1 = arith.constant 0 : i32
    return %c0_i32, %c0_i32_0 : i32, i32
  }
  func.func @transform_6(%arg0: i32) -> (i32, i32) {
    %c0_i32 = arith.constant 0 : i32
    %c0_i32_0 = arith.constant 0 : i32
    %c0_i32_1 = arith.constant 0 : i32
    return %c0_i32, %c0_i32_0 : i32, i32
  }
  func.func @transform_7(%arg0: i32) -> (i32, i32) {
    %c0_i32 = arith.constant 0 : i32
    %c0_i32_0 = arith.constant 0 : i32
    %c0_i32_1 = arith.constant 0 : i32
    return %c0_i32, %c0_i32_0 : i32, i32
  }
  func.func @transform_8(%arg0: i32) -> (i32, i32) {
    %c0_i32 = arith.constant 0 : i32
    %c0_i32_0 = arith.constant 0 : i32
    %c0_i32_1 = arith.constant 0 : i32
    return %c0_i32, %c0_i32_0 : i32, i32
  }
  func.func @transform_9(%arg0: i32) -> (i32, i32) {
    %c0_i32 = arith.constant 0 : i32
    %c0_i32_0 = arith.constant 0 : i32
    %c0_i32_1 = arith.constant 0 : i32
    return %c0_i32, %c0_i32_0 : i32, i32
  }
  func.func @transform_10(%arg0: i32) -> (i32, i32) {
    %c0_i32 = arith.constant 0 : i32
    %c0_i32_0 = arith.constant 0 : i32
    %c0_i32_1 = arith.constant 0 : i32
    return %c0_i32, %c0_i32_0 : i32, i32
  }
  func.func @transform_11(%arg0: i32) -> (i32, i32) {
    %c0_i32 = arith.constant 0 : i32
    %c0_i32_0 = arith.constant 0 : i32
    %c0_i32_1 = arith.constant 0 : i32
    return %c0_i32, %c0_i32_0 : i32, i32
  }
  func.func @transform_12(%arg0: i32) -> (i32, i32, i32) {
    %c0_i32 = arith.constant 0 : i32
    %c0_i32_0 = arith.constant 0 : i32
    %c0_i32_1 = arith.constant 0 : i32
    return %arg0, %c0_i32, %c0_i32_0 : i32, i32, i32
  }
}

</mosaic_0001>

<bundles_post_ra>
// kernel: tpu_custom_call.1
= control target key start
LH: loop header
LB: loop body
LE: loop exit
PB: predicated region body
PF: predicated region fallthrough
CT: control target
= control target key end

     0   :  { %s1484_s0 = inlined_call_operand.vmem [shape: f32[2,1,8], index: 0, kind: input, shape index: {}]   ;;  %s1485_s1 = inlined_call_operand.vmem [shape: f32[2,8,32], index: 1, kind: input, shape index: {}]   ;;  %s1486_s2 = inlined_call_operand.vmem [shape: f32[32,96], index: 2, kind: input, shape index: {}]   ;;  %s1487_s3 = inlined_call_operand.vmem [shape: f32[1,96], index: 3, kind: input, shape index: {}]   ;;  %s1488_s4 = inlined_call_operand.vmem [shape: f32[32,32], index: 4, kind: input, shape index: {}]   ;;  %s1489_s5 = inlined_call_operand.vmem [shape: f32[1,32], index: 5, kind: input, shape index: {}]   ;;  %s1490_s6 = inlined_call_operand.vmem [shape: f32[32,128], index: 6, kind: input, shape index: {}]   ;;  %s1491_s7 = inlined_call_operand.vmem [shape: f32[1,128], index: 7, kind: input, shape index: {}]   ;;  %s1492_s8 = inlined_call_operand.vmem [shape: f32[128,32], index: 8, kind: input, shape index: {}]   ;;  %s1493_s9 = inlined_call_operand.vmem [shape: f32[1,32], index: 9, kind: input, shape index: {}]   ;;  %s1494_s10 = inlined_call_operand.vmem [shape: f32[1,32], index: 10, kind: input, shape index: {}]   ;;  %s1495_s11 = inlined_call_operand.vmem [shape: f32[1,32], index: 11, kind: input, shape index: {}]   ;;  %s1496_s12 = inlined_call_operand.hbm [shape: f32[2,8,32], index: 12, kind: output, shape index: {}]  }
   0x1   :  { %1497 = sst [smem:[#allocation6_spill]] %s1484_s0 }
   0x2   :  { %17 = vsyncpa [#allocation3], 0 }
   0x3   :  { %19 = vsyncpa [#allocation3 + $0x1], 0  ;;  %s1241_s21 = smov 0   ;;  %s1243_s22 = smov 0  }
   0x4   :  { %s1245_s23 = smov 0   ;;  %s1247_s24 = smov 0  }
   0x5 LB: > { %s1262_s25 = sadd.s32 4294967295, %s1164_s24   ;;  %s995_s26 = sadd.s32 4294967294, %s1164_s24   ;;  %s1164_s24 = sphi %s1247_s24, %s1506_s24   ;;  %s1160_s23 = sphi %s1245_s23, %s1505_s23   ;;  %s1156_s22 = sphi %s1243_s22, %s1504_s22   ;;  %s1152_s21 = sphi %s1241_s21, %s1503_s21  }
   0x6   : > { %s1266_s27 = sadd.s32 1, %s1164_s24   ;;  %s294_s28 = sadd.s32 1, %s1160_s23 }
   0x7   : > { %s291_s29 = ssub.s32 %s1164_s24, %s1266_s27  ;;  %p304_p0 = scmp.ne.s32.totalorder %s1160_s23, %s1156_s22 }
   0x8   : > { %p292_p1 = scmp.eq.s32.totalorder %s291_s29, 0  ;;  %p305_p2 = scmp.eq.s32.totalorder %s1262_s25, 1 }
   0x9   : > { %p310_p3 = scmp.ne.s32.totalorder %s1156_s22, %s1152_s21  ;;  %p311_p4 = scmp.eq.s32.totalorder %s995_s26, 1 }
   0xa   : > { %s1277_s30 = scalar_select %p292_p1, %s1160_s23, %s294_s28  }
   0xb   : > { %p1279_p5 = por %p305_p2, %p304_p0  ;;  %p1283_p6 = por %p311_p4, %p310_p3 }
   0xc   : > { %1498 = sst [smem:[#allocation5_spill]] %s1277_s30  ;;  %p998_p7 = scmp.ge.s32.totalorder %s1164_s24, 1 }
   0xd   : > { %p372_p8 = scmp.lt.s32.totalorder %s1164_s24, 3 }
   0xf   : > { %p373_p9 = pnand %p998_p7, %p372_p8 }
  0x10   : > { %p416_p10 = scmp.lt.s32.totalorder (!%p373_p9), %s1262_s25, 1  ;;  %s1166_s20 = smov (!%p373_p9), 104  }
  0x11   : > { %376 = sbr.rel (%p373_p9) target bundleno = 1977 (0x7b9), region = 68  ;;  %s1167_s28 = smov (!%p373_p9), 120  }
  0x12   : > { %s1168_s29 = smov (!%p373_p9), 96   ;;  %s1169_s30 = smov (!%p373_p9), 112  }
  0x13   : > { %s1501_s0 = sld [smem:[#allocation6_spill]] (!%p373_p9)  ;;  %s1172_s18 = smov (!%p373_p9), 16  }
  0x14   : > { %s1173_s19 = smov (!%p373_p9), 8  }
  0x16   : > { %v428_v0 = vld [vmem:[%s1486_s2 + $0x18] sm:$0xff]  ;;  %v427_v1 = vld [vmem:[%s1486_s2 + $0x10] sm:$0xff]  ;;  %v426_v2 = vld [vmem:[%s1486_s2 + $0x8] sm:$0xff]  ;;  %s1300_s26 = scalar_select %p416_p10, %s1262_s25, 1  ;;  %vm433_vm0 = vcmask 261120   ;;  %vm466_vm1 = vcmask 64512  }
  0x17   : > { %449 = vmatpush.msra.mxu1 %v428_v0  ;;  %v425_v3 = vld [vmem:[%s1486_s2] sm:$0xff]  ;;  %v1170_v16 = vmov 0   ;;  %vm738_vm4 = vcmask 130048   ;;  %vm740_vm5 = vcmask 195584  }
  0x18   : > { %s1000_s15 = sshll.u32 %s1300_s26, 3  ;;  %v1074_v5 = vld [vmem:[%s1487_s3] ss:$0 sm:$0xff] }
  0x19   : > { %450 = vmatpush.msra.mxu1 %v427_v1  ;;  %s422_s17 = scalar_lea.vmem %s1485_s1, %s1000_s15 }
  0x1a   : > { %v1309_v4 = vld [vmem:[%s422_s17] sm:$0xff]  ;;  %s418_s17 = scalar_lea.vmem %s1501_s0, %s1300_s26  ;;  %s1171_s26 = smov 64  }
  0x1b   : > { %451 = vmatpush.msra.mxu1 %v426_v2  ;;  %v424_v15 = vld [vmem:[%s418_s17] sm:$0x1] }
  0x1c   : > { %vm569_vm2 = vcmp.gt.f32.partialorder %v424_v15, 0.0 }
  0x1d   : > { %452 = vmatpush.msra.mxu1 %v425_v3  ;;  %v570_v17 = vsel %vm569_vm2, 1, %v1170_v16 }
  0x1e   : > { %1001 = vmatmul.msk.f32.vlgmr.msra.gmra.mxu1 %vm433_vm0, %v1309_v4  ;;  %v571_v18 = vperm.slane %v570_v17, 0 }
  0x20   : > { %vm572_vm3 = vcmp.eq.s32.totalorder %v571_v18, 1 }
  0x9b   : > { %v454_v6 = vpop.f32.mrf.mxu1 }
  0x9c   : > { %v455_v7 = vadd.f32 %v1074_v5, %v454_v6 }
  0x9e   : > { %462 = vrot.lane.b32.xlu1 %v455_v7, %s1166_s20  ;;  %458 = vrot.lane.b32.xlu0 %v455_v7, %s1167_s28  ;;  %s1174_s20 = smov 24   ;;  %s1017_s28 = sshll.u32 %s1262_s25, 3 }
  0x9f   : > { %s922_s15 = scalar_lea.hbm %s1496_s12, %s1017_s28 }
  0xa6   : > { %464 = vrot.lane.b32.xlu1 %v455_v7, %s1168_s29  ;;  %460 = vrot.lane.b32.xlu0 %v455_v7, %s1169_s30 }
 0x110   : > { %v1316_v8 = vpop.permute.xlu1 %462  ;;  %v459_v9 = vpop.permute.xlu0 %458 }
 0x111   : > { %543 = vrot.lane.b32.xlu0 %v1316_v8, %s1168_s29  ;;  %491 = vrot.lane.b32.xlu2 %v459_v9, %s1168_s29  ;;  %v1069_v36 = vpack.i.bf16 %v459_v9, %v455_v7 }
 0x118   : > { %v465_v10 = vpop.permute.xlu1 %464  ;;  %v1319_v11 = vpop.permute.xlu0 %460 }
 0x119   : > { %1002 = vmatpush.xpose.msk.msrb.mxu1 %vm466_vm1, %v465_v10  ;;  %517 = vrot.lane.b32.xlu2 %v1319_v11, %s1168_s29  ;;  %v745_v10 = vld [vmem:[%s1488_s4 + $0x18] sm:$0xff] }
 0x11c   : > { %1003 = vmatmul.msk.f32.vlgmr.msrb.gmra.mxu1 %vm466_vm1, %v455_v7 }
 0x16b   : > { %v492_v12 = vpop.permute.xlu2 %491 }
 0x16c   : > { %1004 = vmatpush.xpose.msk.msra.mxu2 %vm466_vm1, %v492_v12  ;;  %v743_v12 = vld [vmem:[%s1488_s4 + $0x8] sm:$0xff] }
 0x16f   : > { %1005 = vmatmul.msk.f32.vlgmr.msra.gmra.mxu2 %vm466_vm1, %v459_v9 }
 0x173   : > { %v518_v13 = vpop.permute.xlu2 %517 }
 0x174   : > { %1006 = vmatpush.xpose.msk.msra.mxu3 %vm466_vm1, %v518_v13  ;;  %v742_v13 = vld [vmem:[%s1488_s4] sm:$0xff] }
 0x177   : > { %1007 = vmatmul.msk.f32.vlgmr.msra.gmra.mxu3 %vm466_vm1, %v1319_v11 }
 0x183   : > { %v544_v14 = vpop.permute.xlu0 %543 }
 0x184   : > { %1008 = vmatpush.xpose.msk.msra.mxu1 %vm466_vm1, %v544_v14 }
 0x187   : > { %1009 = vmatmul.msk.f32.vlgmr.msra.gmra.mxu1 %vm466_vm1, %v1316_v8 }
 0x199   : > { %v488_v19 = vpop.f32.mrf.mxu1 }
 0x19a   : > { %v573_v20 = vsel %vm572_vm3, -1e+30, %v488_v19 }
 0x19b   : > { %v577_v21 = vsel %vm466_vm1, %v573_v20, -inf }
 0x19c   : > { %578 = vmax.xlane.f32.xlu1 %v577_v21 }
 0x1f2   : > { %v514_v22 = vpop.f32.mrf.mxu2 }
 0x1f3   : > { %v574_v23 = vsel %vm572_vm3, -1e+30, %v514_v22 }
 0x1f4   : > { %v580_v24 = vsel %vm466_vm1, %v574_v23, -inf }
 0x1f5   : > { %581 = vmax.xlane.f32.xlu2 %v580_v24 }
 0x1fa   : > { %v540_v25 = vpop.f32.mrf.mxu3 }
 0x1fb   : > { %v575_v26 = vsel %vm572_vm3, -1e+30, %v540_v25  ;;  %v1175_v25 = vmov 32.0  }
 0x1fc   : > { %v583_v27 = vsel %vm466_vm1, %v575_v26, -inf }
 0x1fd   : > { %584 = vmax.xlane.f32.xlu0 %v583_v27 }
 0x204   : > { %v566_v28 = vpop.f32.mrf.mxu1 }
 0x205   : > { %v576_v29 = vsel %vm572_vm3, -1e+30, %v566_v28 }
 0x206   : > { %v586_v30 = vsel %vm466_vm1, %v576_v29, -inf }
 0x207   : > { %587 = vmax.xlane.f32.xlu2 %v586_v30 }
 0x20f   : > { %v579_v31 = vpop.xlane.xlu1 %578 }
 0x210   : > { %v589_v32 = vsub.f32 %v573_v20, %v579_v31  ;;  %v1075_v20 = vld [vmem:[%s1489_s5] ss:$0 sm:$0xff] }
 0x212   : > { %v593_v33 = vmul.f32 1.442695, %v589_v32 }
 0x214   : > { %1080 = vpow2.f32 %v593_v33 }
 0x21a   : > { %v1081_v34 = vpop.eup %1080 }
 0x21b   : > { %v601_v35 = vsel %vm466_vm1, %v1081_v34, 0.0 }
 0x21c   : > { %602 = vadd.xlane.f32.xlu1 %v601_v35 }
 0x235   : > { %1070 = vrot.lane.b32.xlu1 %v1069_v36, %s1171_s26  ;;  %v816_v36 = vld [vmem:[%s1490_s6 + $0x18] sm:$0xff] }
 0x268   : > { %v582_v39 = vpop.xlane.xlu2 %581 }
 0x269   : > { %v590_v45 = vsub.f32 %v574_v23, %v582_v39  ;;  %v813_v39 = vld [vmem:[%s1490_s6] sm:$0xff] }
 0x26b   : > { %v595_v47 = vmul.f32 1.442695, %v590_v45  ;;  %v857_v45 = vld [vmem:[%s1492_s8 + $0x60] sm:$0xff] }
 0x270   : > { %v585_v37 = vpop.xlane.xlu0 %584 }
 0x271   : > { %v591_v38 = vsub.f32 %v575_v26, %v585_v37  ;;  %v815_v37 = vld [vmem:[%s1490_s6 + $0x10] sm:$0xff] }
 0x273   : > { %v597_v40 = vmul.f32 1.442695, %v591_v38  ;;  %v814_v38 = vld [vmem:[%s1490_s6 + $0x8] sm:$0xff] }
 0x275   : > { %1082 = vpow2.f32 %v597_v40  ;;  %v860_v40 = vld [vmem:[%s1492_s8 + $0x78] sm:$0xff] }
 0x276   : > { %865 = vmatpush.msra.mxu0 %v860_v40 }
 0x27a   : > { %v588_v41 = vpop.xlane.xlu2 %587 }
 0x27b   : > { %v1083_v42 = vpop.eup %1082  ;;  %v592_v43 = vsub.f32 %v576_v29, %v588_v41  ;;  %v859_v41 = vld [vmem:[%s1492_s8 + $0x70] sm:$0xff] }
 0x27c   : > { %v607_v44 = vsel %vm466_vm1, %v1083_v42, 0.0  ;;  %866 = vmatpush.msra.mxu0 %v859_v41 }
 0x27d   : > { %v599_v46 = vmul.f32 1.442695, %v592_v43  ;;  %608 = vadd.xlane.f32.xlu0 %v607_v44 }
 0x27f   : > { %1084 = vpow2.f32 %v599_v46 }
 0x280   : > { %1086 = vpow2.f32 %v595_v47  ;;  %v856_v47 = vld [vmem:[%s1492_s8 + $0x58] sm:$0xff] }
 0x285   : > { %v1085_v48 = vpop.eup %1084 }
 0x286   : > { %v610_v49 = vsel %vm466_vm1, %v1085_v48, 0.0  ;;  %v1087_v50 = vpop.eup %1086 }
 0x287   : > { %611 = vadd.xlane.f32.xlu2 %v610_v49  ;;  %v604_v51 = vsel %vm466_vm1, %v1087_v50, 0.0  ;;  %v854_v49 = vld [vmem:[%s1492_s8 + $0x48] sm:$0xff] }
 0x28f   : > { %605 = vadd.xlane.f32.xlu2 %v604_v51  ;;  %v603_v52 = vpop.xlane.xlu1 %602 }
 0x290   : > { %1088 = vrcp.f32 %v603_v52  ;;  %v852_v52 = vld [vmem:[%s1492_s8 + $0x38] sm:$0xff] }
 0x291   : > { %673 = vrot.lane.b32.xlu0 %v1319_v11, %s1171_s26  ;;  %v744_v11 = vld [vmem:[%s1488_s4 + $0x10] sm:$0xff] }
 0x296   : > { %v1089_v53 = vpop.eup %1088 }
 0x297   : > { %v617_v57 = vmul.f32 %v1089_v53, %v1081_v34 }
 0x2a7   : > { %699 = vrot.lane.b32.xlu2 %v1316_v8, %s1171_s26  ;;  %v1071_v54 = vpop.permute.xlu1 %1070  ;;  %s926_s26 = sshll.u32 %s922_s15, 4  ;;  %s927_s26 = int_to_ptr.hbm [resolvable:$true] %s926_s26 }
 0x2a8   : > { %v1072_v55 = vunpack.i.l.bf16 %v1071_v54  ;;  %v1073_v56 = vunpack.i.h.bf16 %v1071_v54  ;;  %v851_v54 = vld [vmem:[%s1492_s8 + $0x30] sm:$0xff] }
 0x2aa   : > { %642 = vmatpush.msrb.mxu2 %v1072_v55  ;;  %668 = vmatpush.msrb.mxu3 %v1073_v56  ;;  %v850_v56 = vld [vmem:[%s1492_s8 + $0x28] sm:$0xff] }
 0x2ab   : > { %1010 = vmatmul.msk.f32.vlgmr.msrb.gmra.mxu2 %vm466_vm1, %v617_v57 }
 0x2ac   : > { %836 = vmatpush.msra.mxu3 %v816_v36 }
 0x2ae   : > { %837 = vmatpush.msra.mxu3 %v815_v37 }
 0x2b0   : > { %838 = vmatpush.msra.mxu3 %v814_v38 }
 0x2b2   : > { %839 = vmatpush.msra.mxu3 %v813_v39 }
 0x2f0   : > { %v609_v58 = vpop.xlane.xlu0 %608 }
 0x2f1   : > { %1090 = vrcp.f32 %v609_v58  ;;  %v849_v58 = vld [vmem:[%s1492_s8 + $0x20] sm:$0xff] }
 0x2f7   : > { %v1091_v60 = vpop.eup %1090 }
 0x2f8   : > { %v619_v62 = vmul.f32 %v1091_v60, %v1083_v42  ;;  %v858_v42 = vld [vmem:[%s1492_s8 + $0x68] sm:$0xff]  ;;  %v848_v60 = vld [vmem:[%s1492_s8 + $0x18] sm:$0xff] }
 0x2f9   : > { %867 = vmatpush.msra.mxu0 %v858_v42 }
 0x2fa   : > { %v612_v59 = vpop.xlane.xlu2 %611 }
 0x2fb   : > { %1092 = vrcp.f32 %v612_v59  ;;  %868 = vmatpush.msra.mxu0 %v857_v45 }
 0x2fd   : > { %869 = vmatpush.msra.mxu0 %v856_v47 }
 0x301   : > { %v1093_v0 = vpop.eup %1092 }
 0x302   : > { %v606_v61 = vpop.xlane.xlu2 %605  ;;  %v620_v2 = vmul.f32 %v1093_v0, %v1085_v48  ;;  %v855_v48 = vld [vmem:[%s1492_s8 + $0x50] sm:$0xff] }
 0x303   : > { %1094 = vrcp.f32 %v606_v61  ;;  %v674_v63 = vpop.permute.xlu0 %673  ;;  %870 = vmatpush.msra.mxu0 %v855_v48 }
 0x304   : > { %694 = vmatpush.msra.mxu2 %v674_v63  ;;  %1096 = vrcp.f32 %v1175_v25 }
 0x305   : > { %1012 = vmatmul.msk.f32.vlgmr.msra.gmra.mxu2 %vm466_vm1, %v619_v62  ;;  %871 = vmatpush.msra.mxu0 %v854_v49  ;;  %v1076_v62 = vld [vmem:[%s1494_s10] ss:$0 sm:$0xff] }
 0x306   : > { %765 = vmatpush.msrb.mxu2 %v745_v10 }
 0x308   : > { %766 = vmatpush.msrb.mxu2 %v744_v11 }
 0x309   : > { %v1095_v1 = vpop.eup %1094 }
 0x30a   : > { %v700_v3 = vpop.permute.xlu2 %699  ;;  %v618_v5 = vmul.f32 %v1095_v1, %v1087_v50  ;;  %767 = vmatpush.msrb.mxu2 %v743_v12  ;;  %v1097_v26 = vpop.eup %1096  ;;  %v853_v50 = vld [vmem:[%s1492_s8 + $0x40] sm:$0xff] }
 0x30b   : > { %720 = vmatpush.msrb.mxu1 %v700_v3  ;;  %v780_v27 = vmul.f32 32.0, %v1097_v26  ;;  %vm784_vm6 = vweird.f32 %v1097_v26  ;;  %872 = vmatpush.msra.mxu0 %v853_v50  ;;  %v1077_v1 = vld [vmem:[%s1495_s11] ss:$0 sm:$0xff] }
 0x30c   : > { %1011 = vmatmul.msk.f32.vlgmr.msrb.gmra.mxu3 %vm466_vm1, %v618_v5  ;;  %1013 = vmatmul.msk.f32.vlgmr.msrb.gmra.mxu1 %vm466_vm1, %v620_v2  ;;  %v847_v5 = vld [vmem:[%s1492_s8 + $0x10] sm:$0xff]  ;;  %v1079_v12 = vld [vmem:[%s1493_s9] ss:$0 sm:$0xff] }
 0x30d   : > { %768 = vmatpush.msrb.mxu2 %v742_v13  ;;  %v781_v28 = vsub.f32 1.0, %v780_v27  ;;  %873 = vmatpush.msra.mxu0 %v852_v52 }
 0x30f   : > { %v782_v29 = vmul.f32 %v1097_v26, %v781_v28  ;;  %874 = vmatpush.msra.mxu0 %v851_v54 }
 0x311   : > { %v783_v30 = vadd.f32 %v1097_v26, %v782_v29  ;;  %875 = vmatpush.msra.mxu0 %v850_v56 }
 0x313   : > { %v1369_v31 = vsel %vm784_vm6, %v1097_v26, %v783_v30  ;;  %876 = vmatpush.msra.mxu0 %v849_v58 }
 0x315   : > { %877 = vmatpush.msra.mxu0 %v848_v60 }
 0x317   : > { %878 = vmatpush.msra.mxu0 %v847_v5 }
 0x32e   : > { %v644_v6 = vpop.f32.mrf.mxu2 }
 0x388   : > { %v696_v7 = vpop.f32.mrf.mxu2 }
 0x389   : > { %730 = vrot.lane.b32.xlu0 %v696_v7, %s1172_s18  ;;  %v722_v9 = vpop.f32.mrf.mxu1  ;;  %v845_v7 = vld [vmem:[%s1492_s8] sm:$0xff]  ;;  %s1116_s18 = sshra.s32 %s927_s26, 4  ;;  %s1117_s18 = int_to_ptr.hbm [resolvable:$true] %s1116_s18 }
 0x38a   : > { %s1118_s0 = scalar_lea.hbm %s1117_s18, 8  ;;  %p1123_p0 = scmp.lt.s32.totalorder %s1117_s18, %s1496_s12 }
 0x38b   : > { %p1119_p11 = scmp.ne.s32.totalorder %s1117_s18, %s1118_s0 }
 0x38d   : > { %p1120_p12 = pnand %p1119_p11, %p1279_p5 }
 0x38f   : > { %v670_v8 = vpop.f32.mrf.mxu3  ;;  %p1121_p13 = pneg %p1120_p12 }
 0x390   : > { %726 = vrot.lane.b32.xlu1 %v670_v8, %s1173_s19  ;;  %v1078_v8 = vld [vmem:[%s1491_s7] ss:$0 sm:$0xff]  ;;  %s413_s19 = sand.u32 1, %s1156_s22  }
 0x391   : > { %s912_s25 = scalar_lea.sflag [#allocation3], %s413_s19 }
 0x398   : > { %734 = vrot.lane.b32.xlu1 %v722_v9, %s1174_s20  ;;  %s999_s20 = sshll.u32 %s413_s19, 3 }
 0x399   : > { %s415_s16 = scalar_lea.vmem [#allocation2], %s999_s20  ;;  %s1122_s20 = scalar_lea.hbm %s1496_s12, 16 }
 0x39a   : > { %s924_s17 = sshll.u32 %s415_s16, 4  ;;  %p1124_p1 = scmp.lt.s32.totalorder %s1122_s20, %s1118_s0  ;;  %s925_s17 = int_to_ptr.vmem [resolvable:$true] %s924_s17 }
 0x39c   : > { %p1125_p2 = por %p1124_p1, %p1123_p0 }
 0x39e   : > { %p1126_p3 = pnand %p1125_p2, %p1121_p13 }
 0x3fb   : > { %v731_v16 = vpop.permute.xlu0 %730 }
 0x402   : > { %v727_v14 = vpop.permute.xlu1 %726 }
 0x403   : > { %v737_v15 = vsel %vm466_vm1, %v644_v6, %v727_v14  ;;  %v846_v6 = vld [vmem:[%s1492_s8 + $0x8] sm:$0xff] }
 0x404   : > { %v739_v18 = vsel %vm738_vm4, %v737_v15, %v731_v16  ;;  %879 = vmatpush.msra.mxu0 %v846_v6 }
 0x406   : > { %880 = vmatpush.msra.mxu0 %v845_v7 }
 0x40a   : > { %v735_v17 = vpop.permute.xlu1 %734 }
 0x40b   : > { %v741_v19 = vsel %vm740_vm5, %v739_v18, %v735_v17 }
 0x40c   : > { %1014 = vmatmul.msk.f32.vlgmr.msrb.gmra.mxu2 %vm433_vm0, %v741_v19 }
 0x48f   : > { %v770_v21 = vpop.f32.mrf.mxu2 }
 0x490   : > { %v771_v22 = vadd.f32 %v1075_v20, %v770_v21 }
 0x492   : > { %v775_v23 = vadd.f32 %v771_v22, %v1309_v4 }
 0x494   : > { %v776_v24 = vsel %vm433_vm0, %v775_v23, 0.0 }
 0x495   : > { %777 = vadd.xlane.f32.xlu0 %v776_v24 }
 0x508   : > { %v778_v32 = vpop.xlane.xlu0 %777 }
 0x509   : > { %v786_v33 = vmul.f32 %v1369_v31, %v778_v32 }
 0x50b   : > { %v787_v34 = vsub.f32 %v775_v23, %v786_v33 }
 0x50d   : > { %v788_v35 = vmul.f32 %v787_v34, %v787_v34 }
 0x50f   : > { %v789_v4 = vsel %vm433_vm0, %v788_v35, 0.0 }
 0x510   : > { %790 = vadd.xlane.f32.xlu2 %v789_v4 }
 0x583   : > { %v791_v43 = vpop.xlane.xlu2 %790 }
 0x584   : > { %v792_v44 = vmul.f32 %v791_v43, %v1369_v31 }
 0x586   : > { %v793_v46 = vadd.f32 1e-05, %v792_v44 }
 0x588   : > { %1098 = vrsqrt.f32 %v793_v46  ;;  %vm800_vm8 = vweird.f32 %v793_v46 }
 0x58e   : > { %v1099_v51 = vpop.eup %1098 }
 0x58f   : > { %v795_v53 = vmul.f32 %v1099_v51, %v793_v46  ;;  %vm801_vm7 = vweird.f32 %v1099_v51 }
 0x590   : > { %vm802_vm9 = vmor %vm800_vm8, %vm801_vm7 }
 0x591   : > { %v796_v55 = vmul.f32 %v1099_v51, %v795_v53 }
 0x593   : > { %v797_v57 = vmul.f32 0.5, %v796_v55 }
 0x595   : > { %v798_v59 = vsub.f32 1.5, %v797_v57 }
 0x597   : > { %v799_v61 = vmul.f32 %v1099_v51, %v798_v59 }
 0x599   : > { %v803_v63 = vsel %vm802_vm9, %v1099_v51, %v799_v61 }
 0x59a   : > { %v804_v0 = vmul.f32 %v803_v63, %v787_v34 }
 0x59c   : > { %v808_v2 = vmul.f32 %v1076_v62, %v804_v0 }
 0x59e   : > { %v812_v3 = vadd.f32 %v1077_v1, %v808_v2 }
 0x5a0   : > { %1015 = vmatmul.msk.f32.vlgmr.msra.gmra.mxu3 %vm433_vm0, %v812_v3 }
 0x623   : > { %v841_v9 = vpop.f32.mrf.mxu3 }
 0x624   : > { %v842_v10 = vadd.f32 %v1078_v8, %v841_v9 }
 0x626   : > { %v844_v11 = vmax.f32 %v842_v10, 0.0 }
 0x628   : > { %881 = vmatmul.f32.vlgmr.msra.gmra.mxu0 %v844_v11 }
 0x6a5   : > { %v882_v13 = vpop.f32.mrf.mxu0 }
 0x6a6   : > { %v883_v14 = vadd.f32 %v1079_v12, %v882_v13 }
 0x6a8   : > { %v885_v15 = vadd.f32 %v883_v14, %v812_v3 }
 0x6aa   : > { %v886_v16 = vsel %vm433_vm0, %v885_v15, 0.0 }
 0x6ab   : > { %887 = vadd.xlane.f32.xlu1 %v886_v16 }
 0x71e   : > { %v888_v17 = vpop.xlane.xlu1 %887 }
 0x71f   : > { %v889_v18 = vmul.f32 %v888_v17, %v1369_v31 }
 0x721   : > { %v890_v19 = vsub.f32 %v885_v15, %v889_v18 }
 0x723   : > { %v891_v20 = vmul.f32 %v890_v19, %v890_v19 }
 0x725   : > { %v892_v21 = vsel %vm433_vm0, %v891_v20, 0.0 }
 0x726   : > { %893 = vadd.xlane.f32.xlu0 %v892_v21 }
 0x799   : > { %v894_v22 = vpop.xlane.xlu0 %893 }
 0x79a   : > { %v895_v23 = vmul.f32 %v894_v22, %v1369_v31 }
 0x79c   : > { %v896_v24 = vadd.f32 1e-05, %v895_v23 }
 0x79e   : > { %1100 = vrsqrt.f32 %v896_v24  ;;  %vm903_vm11 = vweird.f32 %v896_v24 }
 0x7a4   : > { %v1101_v25 = vpop.eup %1100 }
 0x7a5   : > { %v898_v26 = vmul.f32 %v1101_v25, %v896_v24  ;;  %vm904_vm10 = vweird.f32 %v1101_v25 }
 0x7a6   : > { %vm905_vm12 = vmor %vm903_vm11, %vm904_vm10 }
 0x7a7   : > { %v899_v27 = vmul.f32 %v1101_v25, %v898_v26 }
 0x7a9   : > { %v900_v28 = vmul.f32 0.5, %v899_v27 }
 0x7ab   : > { %v901_v29 = vsub.f32 1.5, %v900_v28 }
 0x7ad   : > { %v902_v30 = vmul.f32 %v1101_v25, %v901_v29 }
 0x7af   : > { %v906_v31 = vsel %vm905_vm12, %v1101_v25, %v902_v30 }
 0x7b0   : > { %v907_v32 = vmul.f32 %v906_v31, %v890_v19 }
 0x7b2   : > { %v908_v33 = vmul.f32 %v1076_v62, %v907_v32 }
 0x7b4   : > { %v909_v34 = vadd.f32 %v1077_v1, %v908_v33 }
 0x7b6   : > { %910 = vst.msk [vmem:[%s415_s16] sm:$0xff] %vm433_vm0, %v909_v34 }
 0x7b7   : > { %1129 = shalt.err (!%p1126_p3)
}
 0x7b8   : > { %1020 = dma.vmem_to_hbm [thread:$0]  (%p1279_p5), %s925_s17, 128, %s927_s26, %s912_s25  }
 0x7b9 PF: > { %p1026_p4 = scmp.ge.s32.totalorder %s1164_s24, 2  ;;  %s938_s19 = sand.u32 1, %s1152_s21  }
 0x7ba   : > { %s939_s16 = scalar_lea.sflag [#allocation3], %s938_s19 }
 0x7bb   : > { %p1023_p7 = pnand %p1026_p4, %p1283_p6 }
 0x7bd   : > { %p1024_p8 = pneg %p1023_p7 }
 0x7bf   : > { %1147 = dma.done.wait (%p1024_p8), %s939_s16, 128  }
 0x7c0   : > { %1149 = vsyncadd (%p1024_p8), %s939_s16, 4294967168  ;;  %s1502_s0 = sld [smem:[#allocation5_spill]]  ;;  %p22_p9 = scmp.ge.s32.totalorder %s1266_s27, 4  }
 0x7c1   : > { %s1503_s21 = smov %s1156_s22  ;;  %s1504_s22 = smov %s1160_s23 }
 0x7c2   : > { %s1506_s24 = smov %s1266_s27  ;;  %24 = sbr.rel (!%p22_p9) target bundleno = 5 (0x5), region = 106 }
 0x7c6   : > { %s1505_s23 = smov %s1502_s0 }
 0x7c7   :  { %945 = vsyncpa [#allocation3], 1 }
 0x7c8   :  { %947 = vsyncpa [#allocation3 + $0x1], 1 }

</bundles_post_ra>
